<compile_context>
chip_gen: v7x
topology: tpu7x:2x2x1
jax: 0.10.0
libtpu: 0.0.40
codegen_flags: <defaults>
</compile_context>

<pallas_src>
import functools

import jax
import jax.numpy as jnp
from jax.experimental import pallas as pl
from jax.experimental.pallas import tpu as pltpu


def _round_up(x, m):
    return ((x + m - 1) // m) * m


def _choose_tb(B, cap):
    """Rows per grid step: multiple of 8, <= cap, targets >=4 tiles for large
    batches (v7x megacore + pipelining) and prefers an exact divisor of B so
    the wrapper never has to jnp.pad x (extra HBM pass)."""
    B8 = _round_up(B, 8)
    tb = max(8, min(_round_up(cap, 8), _round_up(-(-B8 // 4), 8)))
    if B % 8 == 0:
        # Accept a divisor of B in (tb/2, tb]; tile count at most doubles.
        for cand in range(tb, tb // 2, -8):
            if cand >= 8 and B % cand == 0:
                return cand
    return tb


def mlp_kernel(x_ref, w1_ref, b1_ref, w2_ref, b2_ref, o_ref, *, approx_sigmoid):
    # In-kernel cast of x to the matmul dtype (free VPU op; avoids a separate
    # wrapper-side astype pass over HBM).
    x = x_ref[...].astype(w1_ref.dtype)
    # layer1: [TB, n_input] @ [n_input, H_PAD]  (f32 accumulation on the MXU)
    h = jnp.dot(x, w1_ref[...], preferred_element_type=jnp.float32)
    t = h + b1_ref[...]                                   # f32
    # sigmoid(t) = 1 / (1 + exp(-t)); exp + (approx) reciprocal both ride the
    # EUP slot, keeping the VALU slot free.
    h = pl.reciprocal(1.0 + jnp.exp(-t), approx=approx_sigmoid)
    # layer2: [TB, H_PAD] @ [H_PAD, C_PAD]  (padded w2 rows are zero, so the
    # sigmoid(0)=0.5 padded hidden lanes contribute nothing)
    out = jnp.dot(h.astype(w2_ref.dtype), w2_ref[...],
                  preferred_element_type=jnp.float32)
    out = out + b2_ref[...]
    # Store only the valid class lanes; no padded logits are written to HBM.
    nc = o_ref.shape[-1]
    o_ref[...] = out[:, :nc].astype(o_ref.dtype)


def neural_classifier_forward(x, w1, b1, w2, b2, *,
                              block_rows=2048,
                              compute_dtype=jnp.bfloat16,
                              out_dtype=jnp.float32):
    """x: [B, n_input]; w1: [n_input, H]; b1: [1, H]; w2: [H, C]; b2: [1, C]."""
    B, n_input = x.shape
    hidden = w1.shape[1]
    n_classes = w2.shape[1]

    # Lane-align the hidden and class dims used on the MXU (128 lanes/vreg).
    H_PAD = _round_up(max(hidden, 128), 128)
    C_PAD = _round_up(max(n_classes, 128), 128)

    # Zero-pad parameters (one-time, tiny).  Padded w2 ROWS must be exactly
    # zero because the padded hidden activations are sigmoid(0) = 0.5, not 0.
    w1p = jnp.zeros((n_input, H_PAD), compute_dtype).at[:, :hidden].set(
        w1.astype(compute_dtype))
    b1p = jnp.zeros((1, H_PAD), jnp.float32).at[:, :hidden].set(
        b1.astype(jnp.float32))
    w2p = jnp.zeros((H_PAD, C_PAD), compute_dtype).at[:hidden, :n_classes].set(
        w2.astype(compute_dtype))
    b2p = jnp.zeros((1, C_PAD), jnp.float32).at[:, :n_classes].set(
        b2.astype(jnp.float32))

    TB = _choose_tb(B, block_rows)
    Bp = _round_up(B, TB)
    xp = x
    if Bp != B:
        # Fallback only for ragged batches _choose_tb could not divide exactly.
        xp = jnp.pad(x, ((0, Bp - B), (0, 0)))
    n_tiles = Bp // TB

    # Use the exact reciprocal on the f32 path (tight numerics); the bf16
    # production path uses the EUP approximate reciprocal.
    approx_sigmoid = jnp.dtype(compute_dtype) != jnp.dtype(jnp.float32)

    x_bytes = jnp.dtype(xp.dtype).itemsize
    w_bytes = jnp.dtype(compute_dtype).itemsize
    o_bytes = jnp.dtype(out_dtype).itemsize
    cost = pl.CostEstimate(
        flops=2 * Bp * n_input * H_PAD + 2 * Bp * H_PAD * C_PAD,
        transcendentals=2 * Bp * H_PAD,               # exp + reciprocal
        bytes_accessed=(Bp * n_input * x_bytes        # x stream (dominant)
                        + n_input * H_PAD * w_bytes   # w1 (resident)
                        + H_PAD * C_PAD * w_bytes     # w2 (resident)
                        + (H_PAD + C_PAD) * 4         # biases
                        + Bp * n_classes * o_bytes),  # narrow logits out
    )

    out = pl.pallas_call(
        functools.partial(mlp_kernel, approx_sigmoid=approx_sigmoid),
        out_shape=jax.ShapeDtypeStruct((Bp, n_classes), out_dtype),
        grid=(n_tiles,),
        in_specs=[
            pl.BlockSpec((TB, n_input), lambda i: (i, 0)),     # x: tiled rows
            pl.BlockSpec((n_input, H_PAD), lambda i: (0, 0)),  # w1: resident
            pl.BlockSpec((1, H_PAD), lambda i: (0, 0)),        # b1: resident
            pl.BlockSpec((H_PAD, C_PAD), lambda i: (0, 0)),    # w2: resident
            pl.BlockSpec((1, C_PAD), lambda i: (0, 0)),        # b2: resident
        ],
        out_specs=pl.BlockSpec((TB, n_classes), lambda i: (i, 0)),
        compiler_params=pltpu.CompilerParams(
            dimension_semantics=("parallel",),  # megacore on v7x, free elsewhere
        ),
        cost_estimate=cost,
    )(xp, w1p, b1p, w2p, b2p)

    # Strip batch padding only (no column slice needed anymore).
    return out if Bp == B else out[:B]


def init_params(key, n_input, n_classes, hidden=10):
    """Deterministic init mimicking torch.nn.Linear's U(-1/sqrt(fan_in), 1/sqrt(fan_in))."""
    k1, k2, k3, k4 = jax.random.split(key, 4)
    bound1 = 1.0 / jnp.sqrt(jnp.float32(n_input))
    bound2 = 1.0 / jnp.sqrt(jnp.float32(hidden))
    w1 = jax.random.uniform(k1, (n_input, hidden), jnp.float32, -bound1, bound1)
    b1 = jax.random.uniform(k2, (1, hidden), jnp.float32, -bound1, bound1)
    w2 = jax.random.uniform(k3, (hidden, n_classes), jnp.float32, -bound2, bound2)
    b2 = jax.random.uniform(k4, (1, n_classes), jnp.float32, -bound2, bound2)
    return w1, b1, w2, b2


def _reference(x, w1, b1, w2, b2):
    return jax.nn.sigmoid(x @ w1 + b1) @ w2 + b2


if __name__ == "__main__":
    key = jax.random.PRNGKey(0)
    k_x, k_p, k_x2 = jax.random.split(key, 3)

    n_input, n_classes = 32, 4
    w1, b1, w2, b2 = init_params(k_p, n_input, n_classes)

    # Small sanity check (single grid step), default bf16 compute path.
    batch = 8
    x = jax.random.normal(k_x, (batch, n_input), jnp.float32)
    ref = _reference(x, w1, b1, w2, b2)

    out_bf16 = jax.block_until_ready(neural_classifier_forward(x, w1, b1, w2, b2))
    assert out_bf16.shape == (batch, n_classes)
    assert jnp.allclose(out_bf16, ref, atol=5e-2, rtol=5e-2), "bf16 path mismatch"

    # f32 compute path (exact sigmoid reciprocal), tight tolerance.
    out_f32 = jax.block_until_ready(
        neural_classifier_forward(x, w1, b1, w2, b2, compute_dtype=jnp.float32))
    assert jnp.allclose(out_f32, ref, atol=1e-4, rtol=1e-4), "f32 path mismatch"

    # Multi-tile batch: 512 rows -> TB=128, 4 tiles (exercises the parallel grid).
    batch2 = 512
    x2 = jax.random.normal(k_x2, (batch2, n_input), jnp.float32)
    out2 = jax.block_until_ready(neural_classifier_forward(x2, w1, b1, w2, b2))
    ref2 = _reference(x2, w1, b1, w2, b2)
    assert out2.shape == (batch2, n_classes)
    assert jnp.allclose(out2, ref2, atol=5e-2, rtol=5e-2)

    print("KERNEL_OK")
</pallas_src>

<mosaic_0001>
module attributes {stable_mosaic.version = 11 : i64} {
  func.func @mlp_kernel(%arg0: i32, %arg1: memref<8x32xf32, #tpu.memory_space<vmem>>, %arg2: memref<32x128xbf16, #tpu.memory_space<vmem>>, %arg3: memref<1x128xf32, #tpu.memory_space<vmem>>, %arg4: memref<128x128xbf16, #tpu.memory_space<vmem>>, %arg5: memref<1x128xf32, #tpu.memory_space<vmem>>, %arg6: memref<8x4xf32, #tpu.memory_space<vmem>>) attributes {dimension_semantics = [#tpu.dimension_semantics<parallel>], iteration_bounds = array<i64: 1>, scalar_prefetch = 0 : i64, scratch_operands = 0 : i64, tpu.core_type = #tpu.core_type<tc>, window_params = [{transform_indices = @transform_0, window_bounds = array<i64: 8, 32>}, {pipeline_mode = #tpu.pipeline_mode<synchronous>, transform_indices = @transform_1, window_bounds = array<i64: 32, 128>}, {pipeline_mode = #tpu.pipeline_mode<synchronous>, transform_indices = @transform_2, window_bounds = array<i64: 1, 128>}, {pipeline_mode = #tpu.pipeline_mode<synchronous>, transform_indices = @transform_3, window_bounds = array<i64: 128, 128>}, {pipeline_mode = #tpu.pipeline_mode<synchronous>, transform_indices = @transform_4, window_bounds = array<i64: 1, 128>}, {transform_indices = @transform_5, window_bounds = array<i64: 8, 4>}]} {
    %c0 = arith.constant 0 : index
    %c0_0 = arith.constant 0 : index
    %0 = vector.load %arg1[%c0, %c0_0] : memref<8x32xf32, #tpu.memory_space<vmem>>, vector<8x32xf32>
    %1 = arith.truncf %0 : vector<8x32xf32> to vector<8x32xbf16>
    %c0_1 = arith.constant 0 : index
    %c0_2 = arith.constant 0 : index
    %2 = vector.load %arg2[%c0_1, %c0_2] : memref<32x128xbf16, #tpu.memory_space<vmem>>, vector<32x128xbf16>
    %cst = arith.constant dense<0.000000e+00> : vector<8x128xf32>
    %3 = tpu.matmul %1, %2, %cst {dimension_numbers = #tpu.dot_dimension_numbers<[1], [0], [0], [1], [0, 0, 1, 1], [], []>} : vector<8x32xbf16>, vector<32x128xbf16>, vector<8x128xf32> -> vector<8x128xf32>
    %c0_3 = arith.constant 0 : index
    %c0_4 = arith.constant 0 : index
    %4 = vector.load %arg3[%c0_3, %c0_4] : memref<1x128xf32, #tpu.memory_space<vmem>>, vector<1x128xf32>
    %5 = vector.broadcast %4 : vector<1x128xf32> to vector<8x128xf32>
    %6 = arith.addf %3, %5 : vector<8x128xf32>
    %cst_5 = arith.constant 0.000000e+00 : f32
    %7 = vector.broadcast %cst_5 : f32 to vector<8x128xf32>
    %8 = arith.subf %7, %6 : vector<8x128xf32>
    %9 = math.exp %8 : vector<8x128xf32>
    %cst_6 = arith.constant 1.000000e+00 : f32
    %10 = vector.broadcast %cst_6 : f32 to vector<8x128xf32>
    %11 = arith.addf %10, %9 : vector<8x128xf32>
    %12 = tpu.reciprocal %11 {approx = true} : vector<8x128xf32> -> vector<8x128xf32>
    %13 = arith.truncf %12 : vector<8x128xf32> to vector<8x128xbf16>
    %c0_7 = arith.constant 0 : index
    %c0_8 = arith.constant 0 : index
    %14 = vector.load %arg4[%c0_7, %c0_8] : memref<128x128xbf16, #tpu.memory_space<vmem>>, vector<128x128xbf16>
    %cst_9 = arith.constant dense<0.000000e+00> : vector<8x128xf32>
    %15 = tpu.matmul %13, %14, %cst_9 {dimension_numbers = #tpu.dot_dimension_numbers<[1], [0], [0], [1], [0, 0, 1, 1], [], []>} : vector<8x128xbf16>, vector<128x128xbf16>, vector<8x128xf32> -> vector<8x128xf32>
    %c0_10 = arith.constant 0 : index
    %c0_11 = arith.constant 0 : index
    %16 = vector.load %arg5[%c0_10, %c0_11] : memref<1x128xf32, #tpu.memory_space<vmem>>, vector<1x128xf32>
    %17 = vector.broadcast %16 : vector<1x128xf32> to vector<8x128xf32>
    %18 = arith.addf %15, %17 : vector<8x128xf32>
    %19 = vector.extract_strided_slice %18 {offsets = [0, 0], sizes = [8, 4], strides = [1, 1]} : vector<8x128xf32> to vector<8x4xf32>
    %c0_12 = arith.constant 0 : index
    %c0_13 = arith.constant 0 : index
    %20 = vector.load %arg6[%c0_12, %c0_13] : memref<8x4xf32, #tpu.memory_space<vmem>>, vector<8x4xf32>
    tpu.vector_store %arg6[%c0_12, %c0_13], %19 {strides = array<i32>} : memref<8x4xf32, #tpu.memory_space<vmem>>, vector<8x4xf32>,
    return
  }
  func.func @transform_0(%arg0: i32) -> (i32, i32) {
    %c0_i32 = arith.constant 0 : i32
    %c0_i32_0 = arith.constant 0 : i32
    return %arg0, %c0_i32 : i32, i32
  }
  func.func @transform_1(%arg0: i32) -> (i32, i32) {
    %c0_i32 = arith.constant 0 : i32
    %c0_i32_0 = arith.constant 0 : i32
    %c0_i32_1 = arith.constant 0 : i32
    return %c0_i32, %c0_i32_0 : i32, i32
  }
  func.func @transform_2(%arg0: i32) -> (i32, i32) {
    %c0_i32 = arith.constant 0 : i32
    %c0_i32_0 = arith.constant 0 : i32
    %c0_i32_1 = arith.constant 0 : i32
    return %c0_i32, %c0_i32_0 : i32, i32
  }
  func.func @transform_3(%arg0: i32) -> (i32, i32) {
    %c0_i32 = arith.constant 0 : i32
    %c0_i32_0 = arith.constant 0 : i32
    %c0_i32_1 = arith.constant 0 : i32
    return %c0_i32, %c0_i32_0 : i32, i32
  }
  func.func @transform_4(%arg0: i32) -> (i32, i32) {
    %c0_i32 = arith.constant 0 : i32
    %c0_i32_0 = arith.constant 0 : i32
    %c0_i32_1 = arith.constant 0 : i32
    return %c0_i32, %c0_i32_0 : i32, i32
  }
  func.func @transform_5(%arg0: i32) -> (i32, i32) {
    %c0_i32 = arith.constant 0 : i32
    %c0_i32_0 = arith.constant 0 : i32
    return %arg0, %c0_i32 : i32, i32
  }
}

</mosaic_0001>

<bundles_post_ra>
// kernel: tpu_custom_call.1
= control target key start
LH: loop header
LB: loop body
LE: loop exit
PB: predicated region body
PF: predicated region fallthrough
CT: control target
= control target key end

     0   :  { %10 = vsyncpa [#allocation3], 0  ;;  %s486_s0 = inlined_call_operand.hbm [shape: f32[8,32], index: 0, kind: input, shape index: {}]   ;;  %s487_s1 = inlined_call_operand.hbm [shape: bf16[32,128], index: 1, kind: input, shape index: {}]   ;;  %s488_s2 = inlined_call_operand.vmem [shape: f32[1,128], index: 2, kind: input, shape index: {}]   ;;  %s489_s3 = inlined_call_operand.hbm [shape: bf16[128,128], index: 3, kind: input, shape index: {}]   ;;  %s490_s4 = inlined_call_operand.vmem [shape: f32[1,128], index: 4, kind: input, shape index: {}]   ;;  %s491_s5 = inlined_call_operand.vmem [shape: f32[8,4], index: 5, kind: output, shape index: {}]  }
   0x1   :  { %11 = vsyncpa [#allocation5], 0  ;;  %s398_s18 = smov [#allocation4]   ;;  %s328_s22 = scalar_lea.hbm %s487_s1, 256 }
   0x2   :  { %s27_s19 = sshll.u32 %s398_s18, 4  ;;  %p329_p0 = scmp.ne.s32.totalorder %s487_s1, %s328_s22  ;;  %s28_s19 = int_to_ptr.vmem [resolvable:$true] %s27_s19 }
   0x3   :  { %p332_p1 = scmp.lt.u32.totalorder %s328_s22, %s487_s1 }
   0x5   :  { %p334_p2 = pnand %p332_p1, %p329_p0 }
   0x7   :  { %337 = shalt.err (!%p334_p2)
}
   0x8   :  { %s338_s27 = scalar_lea.vmem %s28_s19, 256  ;;  %p343_p4 = scmp.lt.s32.totalorder %s28_s19, %s28_s19 }
   0x9   :  { %p339_p3 = scmp.ne.s32.totalorder %s28_s19, %s338_s27  ;;  %p344_p5 = scmp.lt.s32.totalorder %s338_s27, %s338_s27 }
   0xb   :  { %p345_p6 = por %p344_p5, %p343_p4 }
   0xd   :  { %p346_p7 = pnand %p345_p6, %p339_p3 }
   0xf   :  { %349 = shalt.err (!%p346_p7)
}
  0x10   :  { %s399_s28 = smov 64   ;;  %s400_s29 = smov 4  }
  0x11   :  { %33 = dma.hbm_to_vmem [thread:$0]  %s487_s1, 256, %s28_s19, [#allocation5], %s399_s28, %s399_s28, %s400_s29  }
  0x12   :  { %s401_s7 = smov [#allocation2]   ;;  %s402_s9 = smov [#allocation6]  }
  0x13   :  { %s18_s8 = sshll.u32 %s401_s7, 4  ;;  %s41_s10 = sshll.u32 %s402_s9, 4  ;;  %s19_s8 = int_to_ptr.vmem [resolvable:$true] %s18_s8  ;;  %s42_s10 = int_to_ptr.vmem [resolvable:$true] %s41_s10 }
  0x14   :  { %s350_s13 = scalar_lea.hbm %s486_s0, 128 }
  0x15   :  { %p351_p8 = scmp.ne.s32.totalorder %s486_s0, %s350_s13  ;;  %p354_p9 = scmp.lt.u32.totalorder %s350_s13, %s486_s0 }
  0x17   :  { %p356_p10 = pnand %p354_p9, %p351_p8 }
  0x19   :  { %359 = shalt.err (!%p356_p10)
}
  0x1a   :  { %s360_s1 = scalar_lea.vmem %s19_s8, 128  ;;  %p365_p12 = scmp.lt.s32.totalorder %s19_s8, %s19_s8 }
  0x1b   :  { %p361_p11 = scmp.ne.s32.totalorder %s19_s8, %s360_s1  ;;  %p366_p13 = scmp.lt.s32.totalorder %s360_s1, %s360_s1 }
  0x1d   :  { %p367_p0 = por %p366_p13, %p365_p12 }
  0x1f   :  { %p368_p1 = pnand %p367_p0, %p361_p11 }
  0x21   :  { %371 = shalt.err (!%p368_p1)
}
  0x22   :  { %21 = dma.hbm_to_vmem [thread:$0]  %s486_s0, 128, %s19_s8, [#allocation3]  }
  0x23   :  { %s372_s22 = scalar_lea.hbm %s489_s3, 1024 }
  0x24   :  { %p373_p2 = scmp.ne.s32.totalorder %s489_s3, %s372_s22  ;;  %p376_p3 = scmp.lt.u32.totalorder %s372_s22, %s489_s3 }
  0x26   :  { %p378_p4 = pnand %p376_p3, %p373_p2 }
  0x28   :  { %381 = shalt.err (!%p378_p4)
}
  0x29   :  { %s382_s27 = scalar_lea.vmem %s42_s10, 1024  ;;  %p387_p6 = scmp.lt.s32.totalorder %s42_s10, %s42_s10 }
  0x2a   :  { %p383_p5 = scmp.ne.s32.totalorder %s42_s10, %s382_s27  ;;  %p388_p7 = scmp.lt.s32.totalorder %s382_s27, %s382_s27 }
  0x2c   :  { %p389_p8 = por %p388_p7, %p387_p6 }
  0x2e   :  { %p390_p9 = pnand %p389_p8, %p383_p5 }
  0x30   :  { %393 = shalt.err (!%p390_p9)
}
  0x31   :  { %47 = dma.hbm_to_vmem [thread:$0]  %s489_s3, 1024, %s42_s10, [#allocation5], %s399_s28, %s399_s28, %s400_s29  }
  0x32   :  { %394 = dma.done.wait [#allocation3], 128  }
  0x33   :  { %395 = vsyncadd [#allocation3], 4294967168 }
  0x34   :  { %396 = dma.done.wait [#allocation5], 1280  }
  0x35   :  { %397 = vsyncadd [#allocation5], 4294966016  ;;  %v403_v0 = vmov 0.0   ;;  %vm404_vm0 = vmmov 0   ;;  %v314_v1 = vld [vmem:[#allocation4] sm:$0xff]   ;;  %v315_v2 = vld [vmem:[#allocation4 + $0x8] sm:$0xff]  }
  0x36   :  { %279 = vmatprep.subr.bf16.mxu0 %v403_v0  ;;  %283 = vmatprep.mubr.msk.bf16.mxu0 %vm404_vm0, %v403_v0  ;;  %v60_v3 = vld [vmem:[#allocation2] sm:$0xff]  ;;  %vm85_vm1 = vcmask 261120   ;;  %v316_v5 = vld [vmem:[#allocation6] sm:$0xff]   ;;  %v318_v7 = vld [vmem:[#allocation6 + $0x10] sm:$0xff]   ;;  %vm246_vm2 = vcmask 31744  }
  0x37   :  { %287 = vmatprep.subr.bf16.mxu1 %v403_v0  ;;  %303 = vmatprep.mubr.msk.bf16.mxu1 %vm404_vm0, %v403_v0  ;;  %v61_v4 = vpack.c.bf16 %v60_v3, %v60_v3  ;;  %v317_v6 = vld [vmem:[#allocation6 + $0x8] sm:$0xff]   ;;  %v319_v8 = vld [vmem:[#allocation6 + $0x18] sm:$0xff]   ;;  %v320_v9 = vld [vmem:[#allocation6 + $0x20] sm:$0xff]  }
  0x38   :  { %280 = vmatpush3.bf16.msra.mxu0 %v314_v1  ;;  %288 = vmatpush3.bf16.msra.mxu1 %v316_v5  ;;  %v321_v10 = vld [vmem:[#allocation6 + $0x28] sm:$0xff]   ;;  %v322_v11 = vld [vmem:[#allocation6 + $0x30] sm:$0xff]   ;;  %v323_v12 = vld [vmem:[#allocation6 + $0x38] sm:$0xff]  }
  0x39   :  { %281 = vmatprep.subr.bf16.mxu0 %v403_v0  ;;  %289 = vmatprep.subr.bf16.mxu1 %v403_v0  ;;  %v254_v13 = vld [vmem:[%s488_s2] ss:$0 sm:$0xff] }
  0x3a   :  { %v258_v25 = vld [vmem:[%s490_s4] ss:$0 sm:$0xff] }
  0x3c   :  { %282 = vmatpush3.bf16.msra.mxu0 %v315_v2  ;;  %290 = vmatpush3.bf16.msra.mxu1 %v317_v6 }
  0x3d   :  { %291 = vmatprep.subr.bf16.mxu1 %v403_v0 }
  0x3f   :  { %284 = vmatmul.mubr.msk.bf16.vlgmr.msra.gmra.mrb[0].mxu0 %vm85_vm1, %v61_v4 }
  0x40   :  { %292 = vmatpush3.bf16.msra.mxu1 %v318_v7 }
  0x41   :  { %293 = vmatprep.subr.bf16.mxu1 %v403_v0 }
  0x44   :  { %294 = vmatpush3.bf16.msra.mxu1 %v319_v8 }
  0x45   :  { %295 = vmatprep.subr.bf16.mxu1 %v403_v0 }
  0x48   :  { %296 = vmatpush3.bf16.msra.mxu1 %v320_v9 }
  0x49   :  { %297 = vmatprep.subr.bf16.mxu1 %v403_v0 }
  0x4c   :  { %298 = vmatpush3.bf16.msra.mxu1 %v321_v10 }
  0x4d   :  { %299 = vmatprep.subr.bf16.mxu1 %v403_v0 }
  0x50   :  { %300 = vmatpush3.bf16.msra.mxu1 %v322_v11 }
  0x51   :  { %301 = vmatprep.subr.bf16.mxu1 %v403_v0 }
  0x54   :  { %302 = vmatpush3.bf16.msra.mxu1 %v323_v12 }
 0x112   :  { %v123_v14 = vpop.f32.mrb[0].mxu0 }
 0x113   :  { %v124_v15 = vadd.f32 %v254_v13, %v123_v14  ;;  %v285_v16 = vpop.f32.mrb[1].mxu0 }
 0x114   :  { %v126_v17 = vpop.f32.mrb[2].mxu0 }
 0x115   :  { %v129_v18 = vsub.f32 0.0, %v124_v15  ;;  %v286_v19 = vpop.f32.mrb[3].mxu0 }
 0x117   :  { %v130_v20 = vmul.f32 1.442695, %v129_v18 }
 0x119   :  { %324 = vpow2.f32 %v130_v20 }
 0x123   :  { %v325_v21 = vpop.eup %324 }
 0x124   :  { %v132_v22 = vadd.f32 1.0, %v325_v21 }
 0x126   :  { %326 = vrcp.f32 %v132_v22 }
 0x130   :  { %v327_v23 = vpop.eup %326 }
 0x131   :  { %v134_v24 = vpack.c.bf16 %v327_v23, %v327_v23 }
 0x133   :  { %304 = vmatmul.mubr.bf16.vlgmr.msra.gmra.mrb[0].mxu1 %v134_v24 }
 0x206   :  { %v240_v26 = vpop.f32.mrb[0].mxu1 }
 0x207   :  { %v241_v27 = vadd.f32 %v258_v25, %v240_v26  ;;  %v305_v28 = vpop.f32.mrb[1].mxu1 }
 0x208   :  { %v243_v29 = vpop.f32.mrb[2].mxu1 }
 0x209   :  { %247 = vst.msk [vmem:[%s491_s5] sm:$0xff] %vm246_vm2, %v241_v27  ;;  %v306_v30 = vpop.f32.mrb[3].mxu1 }
 0x20a   :  { %252 = vsyncpa [#allocation3], 1 }
 0x20b   :  { %253 = vsyncpa [#allocation5], 1 }

</bundles_post_ra>
